<compile_context>
chip_gen: v7x
topology: tpu7x:2x2x1
jax: 0.10.0
libtpu: 0.0.40
codegen_flags: <defaults>
</compile_context>

<pallas_src>
import functools
import math

import jax
import jax.numpy as jnp
from jax.experimental import pallas as pl
from jax.experimental.pallas import tpu as pltpu


def _cdiv(a, b):
    return (a + b - 1) // b


def _round_up(a, b):
    return _cdiv(a, b) * b


def _patch_embed_gemm_kernel(p_ref, w_ref, b_ref, o_ref, acc_ref):
    # p_ref: (TM, TK) grouped patch rows (compute dtype, e.g. bf16)
    # w_ref: (TK, Eg) block-diagonal projection weight (compute dtype)
    # b_ref: (1, Eg)  tiled bias, f32
    # o_ref: (TM, Eg) output
    # acc_ref: (TM, Eg) f32 accumulator (resident across the K grid axis)
    k = pl.program_id(1)

    @pl.when(k == 0)
    def _():
        acc_ref[...] = jnp.zeros_like(acc_ref)

    acc_ref[...] += jnp.dot(p_ref[...], w_ref[...],
                            preferred_element_type=jnp.float32)

    @pl.when(k == pl.num_programs(1) - 1)
    def _():
        o_ref[...] = (acc_ref[...] + b_ref[...]).astype(o_ref.dtype)


def _mxu_contraction_target():
    """~128 for v5e-and-older (128x128 MXU tiles), ~256 for v6e / v7x (256x256)."""
    try:
        kind = jax.devices()[0].device_kind.lower()
    except Exception:
        return 256
    for tag in ("v2", "v3", "v4", "v5"):
        if tag in kind:
            return 128
    return 256


def _choose_group(E, K, k_target, compute_itemsize, max_weight_bytes=8 << 20):
    """Pick the row-group factor g and padded embed width so g*E_pad % 128 == 0."""
    if E % 128 == 0:
        return 1, E
    g_min = 128 // math.gcd(E, 128)          # minimal g making g*E lane-aligned
    if g_min <= 32:
        g = g_min * max(1, k_target // (g_min * K))   # grow g to fill MXU contraction
        g = min(g, 32)                                 # 32 is a multiple of any g_min<=32
        if (g * K) * (g * E) * compute_itemsize <= max_weight_bytes:
            return g, E
    # Fallback: no grouping; pad E to a multiple of 128 with zero weight columns so
    # stores stay full-width (no lane-sparse vst.msk), slice the output afterwards.
    return 1, _round_up(E, 128)


def patch_embed(x, w, b, patch_size, *, block_rows=512,
                compute_dtype=jnp.bfloat16, out_dtype=None,
                vmem_budget_bytes=20 << 20, max_tk=2048):
    """PatchEmbed forward.  x: (B,C,H,W); w: (E,C,p,p); b: (E,) -> (B, H/p*W/p, E)."""
    B, C, H, W = x.shape
    p = patch_size
    assert H % p == 0 and W % p == 0
    Hp, Wp = H // p, W // p
    num_patches = Hp * Wp
    E = w.shape[0]
    K = C * p * p
    M = B * num_patches
    out_dtype = x.dtype if out_dtype is None else out_dtype
    cb = jnp.dtype(compute_dtype).itemsize
    ob = jnp.dtype(out_dtype).itemsize

    # ---- im2col: pure data movement, matches Conv2d's (c, kh, kw) flattening order. ----
    # Cast FIRST so the relayout only moves compute-dtype (bf16) bytes.
    # TODO(synk): fold the im2col into the kernel (BlockSpec over x + in-VMEM relayout)
    # to remove the one remaining XLA transpose pass over the input.
    xc = x.astype(compute_dtype)
    patches = xc.reshape(B, C, Hp, p, Wp, p)
    patches = jnp.transpose(patches, (0, 2, 4, 1, 3, 5)).reshape(M, K)
    wt = w.reshape(E, K).T.astype(compute_dtype)              # (K, E)
    bias = b.astype(jnp.float32)

    # ---- lane-dense output grouping / E padding ----
    g, E_pad = _choose_group(E, K, _mxu_contraction_target(), cb)
    if E_pad != E:
        wt = jnp.pad(wt, ((0, 0), (0, E_pad - E)))
        bias = jnp.pad(bias, (0, E_pad - E))
    Kg, Eg = g * K, g * E_pad

    # ---- contraction (K) tiling ----
    if Kg <= max_tk:
        grid_k, TK, Kg_pad = 1, Kg, Kg
    else:
        TK = max_tk                                            # multiple of 128
        grid_k = _cdiv(Kg, TK)
        Kg_pad = grid_k * TK

    # ---- row (M) tiling from a VMEM budget + >= ~4 steps so v7x megacore has work ----
    fixed = 2 * TK * Eg * cb + 2 * Eg * 4                      # weight + bias buffers
    per_row = 2 * TK * cb + 2 * Eg * ob + 4 * Eg               # LHS/out double-buf + f32 acc
    Mg = _cdiv(M, g)
    tm_cap = max(8, (vmem_budget_bytes - fixed) // per_row)
    TM = min(block_rows, tm_cap, _round_up(_cdiv(Mg, 4), 8))
    TM = max(8, (TM // 8) * 8)                                 # 8-aligned sublane dimension
    grid_m = _cdiv(Mg, TM)
    Mg_pad = grid_m * TM
    M_pad = Mg_pad * g

    if M_pad != M:
        patches = jnp.pad(patches, ((0, M_pad - M), (0, 0)))
    patches_g = patches.reshape(Mg_pad, Kg)                    # row-major group of g rows
    if Kg_pad != Kg:
        patches_g = jnp.pad(patches_g, ((0, 0), (0, Kg_pad - Kg)))

    w_g = jnp.kron(jnp.eye(g, dtype=wt.dtype), wt)             # (Kg, Eg) block-diagonal
    if Kg_pad != Kg:
        w_g = jnp.pad(w_g, ((0, Kg_pad - Kg), (0, 0)))
    b_g = jnp.tile(bias.reshape(1, E_pad), (1, g))             # (1, Eg), f32

    cost = pl.CostEstimate(
        flops=int(2 * M * K * E),                              # true (ungrouped) FLOPs
        transcendentals=0,
        bytes_accessed=int(M * K * cb + K * E * cb + E * 4 + M * E * ob))

    out = pl.pallas_call(
        _patch_embed_gemm_kernel,
        out_shape=jax.ShapeDtypeStruct((Mg_pad, Eg), out_dtype),
        grid_spec=pltpu.PrefetchScalarGridSpec(
            num_scalar_prefetch=0,
            grid=(grid_m, grid_k),
            in_specs=[
                pl.BlockSpec((TM, TK), lambda i, k: (i, k)),
                pl.BlockSpec((TK, Eg), lambda i, k: (k, 0)),   # weight (VMEM-resident if grid_k==1)
                pl.BlockSpec((1, Eg), lambda i, k: (0, 0)),    # bias, VMEM-resident
            ],
            out_specs=pl.BlockSpec((TM, Eg), lambda i, k: (i, 0)),
            scratch_shapes=[pltpu.VMEM((TM, Eg), jnp.float32)],
        ),
        compiler_params=pltpu.CompilerParams(
            dimension_semantics=("parallel", "arbitrary"),
            vmem_limit_bytes=32 * 1024 * 1024),
        cost_estimate=cost,
    )(patches_g, w_g, b_g)

    # Undo row grouping (bit-identical row-major relayout) and strip row / lane padding.
    out = out.reshape(Mg_pad * g, E_pad)[:M, :E].reshape(B, num_patches, E)
    return out


def reference_conv(x, w, b, patch_size):
    """Plain-JAX mirror of the PyTorch forward: Conv2d(stride=kernel) -> flatten(2) -> transpose."""
    y = jax.lax.conv_general_dilated(
        x, w, window_strides=(patch_size, patch_size), padding="VALID",
        dimension_numbers=("NCHW", "OIHW", "NCHW"),
        precision=jax.lax.Precision.HIGHEST)
    y = y + b.reshape(1, -1, 1, 1)
    B, E, Hp, Wp = y.shape
    return y.reshape(B, E, Hp * Wp).transpose(0, 2, 1)


if __name__ == "__main__":
    # Module-consistent small shapes: in_chans=1 (default), embed_dim=64 (default),
    # patch_size=4, batch=2, 16x16 image -> 16 patches of dim 64.
    patch_size = 4
    in_chans = 1
    embed_dim = 64
    Bsz, Himg, Wimg = 2, 16, 16

    key = jax.random.PRNGKey(0)
    kx, kw, kb = jax.random.split(key, 3)
    fan_in = in_chans * patch_size * patch_size
    bound = 1.0 / math.sqrt(fan_in)            # PyTorch Conv2d default init bound
    w = jax.random.uniform(kw, (embed_dim, in_chans, patch_size, patch_size),
                           jnp.float32, -bound, bound)
    b = jax.random.uniform(kb, (embed_dim,), jnp.float32, -bound, bound)
    x = jax.random.normal(kx, (Bsz, in_chans, Himg, Wimg), jnp.float32)

    num_patches = (Himg // patch_size) * (Wimg // patch_size)
    ref = reference_conv(x, w, b, patch_size)

    # 1) f32 compute path: tight semantic check against the Conv2d reference.
    pe_f32 = jax.jit(functools.partial(patch_embed, patch_size=patch_size,
                                       compute_dtype=jnp.float32))
    out_f32 = jax.block_until_ready(pe_f32(x, w, b))
    assert out_f32.shape == (Bsz, num_patches, embed_dim)
    assert jnp.allclose(out_f32, ref, atol=1e-3, rtol=1e-3), \
        float(jnp.max(jnp.abs(out_f32 - ref)))

    # 2) Default path: bf16 operands / f32 accumulate.  Tight check against the same
    #    bf16-rounded math in plain XLA; loose check against the f32 conv reference.
    pe_bf16 = jax.jit(functools.partial(patch_embed, patch_size=patch_size))
    out_bf16 = jax.block_until_ready(pe_bf16(x, w, b))
    assert out_bf16.shape == (Bsz, num_patches, embed_dim)

    Kdim = in_chans * patch_size * patch_size
    patches_ref = jnp.transpose(
        x.astype(jnp.bfloat16).reshape(Bsz, in_chans, Himg // patch_size, patch_size,
                                       Wimg // patch_size, patch_size),
        (0, 2, 4, 1, 3, 5)).reshape(-1, Kdim)
    ref_bf16 = (jnp.dot(patches_ref, w.reshape(embed_dim, Kdim).T.astype(jnp.bfloat16),
                        preferred_element_type=jnp.float32)
                + b).reshape(Bsz, num_patches, embed_dim)
    assert jnp.allclose(out_bf16, ref_bf16, atol=1e-5, rtol=1e-5), \
        float(jnp.max(jnp.abs(out_bf16 - ref_bf16)))
    assert jnp.allclose(out_bf16, ref, atol=5e-2, rtol=5e-2), \
        float(jnp.max(jnp.abs(out_bf16 - ref)))

    print("KERNEL_OK")
</pallas_src>

<mosaic_0001>
module attributes {stable_mosaic.version = 11 : i64} {
  func.func @_patch_embed_gemm_kernel(%arg0: i32, %arg1: i32, %arg2: memref<8x256xf32, #tpu.memory_space<vmem>>, %arg3: memref<256x1024xf32, #tpu.memory_space<vmem>>, %arg4: memref<1x1024xf32, #tpu.memory_space<vmem>>, %arg5: memref<8x1024xf32, #tpu.memory_space<vmem>>, %arg6: memref<8x1024xf32, #tpu.memory_space<vmem>>) attributes {dimension_semantics = [#tpu.dimension_semantics<parallel>, #tpu.dimension_semantics<arbitrary>], iteration_bounds = array<i64: 1, 1>, scalar_prefetch = 0 : i64, scratch_operands = 1 : i64, tpu.core_type = #tpu.core_type<tc>, window_params = [{transform_indices = @transform_0, window_bounds = array<i64: 8, 256>}, {transform_indices = @transform_1, window_bounds = array<i64: 256, 1024>}, {pipeline_mode = #tpu.pipeline_mode<synchronous>, transform_indices = @transform_2, window_bounds = array<i64: 1, 1024>}, {transform_indices = @transform_3, window_bounds = array<i64: 8, 1024>}]} {
    %c0_i32 = arith.constant 0 : i32
    %0 = arith.cmpi eq, %arg1, %c0_i32 : i32
    %1 = arith.extui %0 : i1 to i32
    %c0_i32_0 = arith.constant 0 : i32
    %2 = arith.cmpi ne, %1, %c0_i32_0 : i32
    scf.if %2 {
      %cst_10 = arith.constant 0.000000e+00 : f32
      %12 = vector.broadcast %cst_10 : f32 to vector<8x1024xf32>
      %c0_11 = arith.constant 0 : index
      %c0_12 = arith.constant 0 : index
      %13 = vector.load %arg6[%c0_11, %c0_12] : memref<8x1024xf32, #tpu.memory_space<vmem>>, vector<8x1024xf32>
      tpu.vector_store %arg6[%c0_11, %c0_12], %12 {strides = array<i32>} : memref<8x1024xf32, #tpu.memory_space<vmem>>, vector<8x1024xf32>,
    } else {
    }
    %c0 = arith.constant 0 : index
    %c0_1 = arith.constant 0 : index
    %3 = vector.load %arg6[%c0, %c0_1] : memref<8x1024xf32, #tpu.memory_space<vmem>>, vector<8x1024xf32>
    %c0_2 = arith.constant 0 : index
    %c0_3 = arith.constant 0 : index
    %4 = vector.load %arg2[%c0_2, %c0_3] : memref<8x256xf32, #tpu.memory_space<vmem>>, vector<8x256xf32>
    %c0_4 = arith.constant 0 : index
    %c0_5 = arith.constant 0 : index
    %5 = vector.load %arg3[%c0_4, %c0_5] : memref<256x1024xf32, #tpu.memory_space<vmem>>, vector<256x1024xf32>
    %cst = arith.constant dense<0.000000e+00> : vector<8x1024xf32>
    %6 = tpu.matmul %4, %5, %cst {dimension_numbers = #tpu.dot_dimension_numbers<[1], [0], [0], [1], [0, 0, 1, 1], [], []>} : vector<8x256xf32>, vector<256x1024xf32>, vector<8x1024xf32> -> vector<8x1024xf32>
    %7 = arith.addf %3, %6 : vector<8x1024xf32>
    %c0_6 = arith.constant 0 : index
    %c0_7 = arith.constant 0 : index
    %8 = vector.load %arg6[%c0_6, %c0_7] : memref<8x1024xf32, #tpu.memory_space<vmem>>, vector<8x1024xf32>
    tpu.vector_store %arg6[%c0_6, %c0_7], %7 {strides = array<i32>} : memref<8x1024xf32, #tpu.memory_space<vmem>>, vector<8x1024xf32>,
    %c0_i32_8 = arith.constant 0 : i32
    %9 = arith.cmpi eq, %arg1, %c0_i32_8 : i32
    %10 = arith.extui %9 : i1 to i32
    %c0_i32_9 = arith.constant 0 : i32
    %11 = arith.cmpi ne, %10, %c0_i32_9 : i32
    scf.if %11 {
      %c0_10 = arith.constant 0 : index
      %c0_11 = arith.constant 0 : index
      %12 = vector.load %arg6[%c0_10, %c0_11] : memref<8x1024xf32, #tpu.memory_space<vmem>>, vector<8x1024xf32>
      %c0_12 = arith.constant 0 : index
      %c0_13 = arith.constant 0 : index
      %13 = vector.load %arg4[%c0_12, %c0_13] : memref<1x1024xf32, #tpu.memory_space<vmem>>, vector<1x1024xf32>
      %14 = vector.broadcast %13 : vector<1x1024xf32> to vector<8x1024xf32>
      %15 = arith.addf %12, %14 : vector<8x1024xf32>
      %c0_14 = arith.constant 0 : index
      %c0_15 = arith.constant 0 : index
      %16 = vector.load %arg5[%c0_14, %c0_15] : memref<8x1024xf32, #tpu.memory_space<vmem>>, vector<8x1024xf32>
      tpu.vector_store %arg5[%c0_14, %c0_15], %15 {strides = array<i32>} : memref<8x1024xf32, #tpu.memory_space<vmem>>, vector<8x1024xf32>,
    } else {
    }
    return
  }
  func.func @transform_0(%arg0: i32, %arg1: i32) -> (i32, i32) {
    %c0_i32 = arith.constant 0 : i32
    return %arg0, %arg1 : i32, i32
  }
  func.func @transform_1(%arg0: i32, %arg1: i32) -> (i32, i32) {
    %c0_i32 = arith.constant 0 : i32
    %c0_i32_0 = arith.constant 0 : i32
    return %arg1, %c0_i32 : i32, i32
  }
  func.func @transform_2(%arg0: i32, %arg1: i32) -> (i32, i32) {
    %c0_i32 = arith.constant 0 : i32
    %c0_i32_0 = arith.constant 0 : i32
    %c0_i32_1 = arith.constant 0 : i32
    return %c0_i32, %c0_i32_0 : i32, i32
  }
  func.func @transform_3(%arg0: i32, %arg1: i32) -> (i32, i32) {
    %c0_i32 = arith.constant 0 : i32
    %c0_i32_0 = arith.constant 0 : i32
    return %arg0, %c0_i32 : i32, i32
  }
}

</mosaic_0001>

<bundles_post_ra>
// kernel: patch_embed.1
= control target key start
LH: loop header
LB: loop body
LE: loop exit
PB: predicated region body
PF: predicated region fallthrough
CT: control target
= control target key end

     0   :  { %s1754_s1 = inlined_call_operand.vmem [shape: f32[256,1024], index: 1, kind: input, shape index: {}]   ;;  %s1755_s0 = inlined_call_operand.vmem [shape: f32[8,256], index: 0, kind: input, shape index: {}]   ;;  %s1756_s2 = inlined_call_operand.vmem [shape: f32[1,1024], index: 2, kind: input, shape index: {}]   ;;  %s1757_s3 = inlined_call_operand.vmem [shape: f32[8,1024], index: 3, kind: output, shape index: {}]  }
   0x1   :  { %v37_v0 = vld [vmem:[%s1754_s1 + $0x8] sm:$0xff]  ;;  %v39_v2 = vld [vmem:[%s1754_s1 + $0x18] sm:$0xff]  ;;  %v36_v5 = vld [vmem:[%s1754_s1] sm:$0xff] }
   0x2   :  { %v45_v1 = vld [vmem:[%s1754_s1 + $0x48] sm:$0xff]  ;;  %v47_v4 = vld [vmem:[%s1754_s1 + $0x58] sm:$0xff]  ;;  %v44_v6 = vld [vmem:[%s1754_s1 + $0x40] sm:$0xff] }
   0x3   :  { %v665_v3 = vpack.c.bf16 %v45_v1, %v37_v0  ;;  %v729_v7 = vpack.c.bf16 %v47_v4, %v39_v2  ;;  %v667_v8 = vpack.c.bf16 %v44_v6, %v36_v5  ;;  %v38_v9 = vld [vmem:[%s1754_s1 + $0x10] sm:$0xff]  ;;  %v53_v11 = vld [vmem:[%s1754_s1 + $0x88] sm:$0xff]  ;;  %v55_v14 = vld [vmem:[%s1754_s1 + $0x98] sm:$0xff] }
   0x4   :  { %v46_v10 = vld [vmem:[%s1754_s1 + $0x50] sm:$0xff]  ;;  %v61_v13 = vld [vmem:[%s1754_s1 + $0xc8] sm:$0xff]  ;;  %v63_v15 = vld [vmem:[%s1754_s1 + $0xd8] sm:$0xff] }
   0x5   :  { %666 = vmatprep.subr.bf16.mxu0 %v665_v3  ;;  %v731_v12 = vpack.c.bf16 %v46_v10, %v38_v9  ;;  %730 = vmatprep.subr.bf16.mxu1 %v729_v7  ;;  %v669_v16 = vpack.c.bf16 %v61_v13, %v53_v11  ;;  %v733_v17 = vpack.c.bf16 %v63_v15, %v55_v14  ;;  %v52_v18 = vld [vmem:[%s1754_s1 + $0x80] sm:$0xff]  ;;  %v54_v20 = vld [vmem:[%s1754_s1 + $0x90] sm:$0xff]  ;;  %v69_v23 = vld [vmem:[%s1754_s1 + $0x108] sm:$0xff] }
   0x6   :  { %668 = vmatpush1.bf16.msra.mxu0 %v667_v8  ;;  %v60_v19 = vld [vmem:[%s1754_s1 + $0xc0] sm:$0xff]  ;;  %v62_v22 = vld [vmem:[%s1754_s1 + $0xd0] sm:$0xff]  ;;  %v77_v24 = vld [vmem:[%s1754_s1 + $0x148] sm:$0xff] }
   0x7   :  { %732 = vmatpush1.bf16.msra.mxu1 %v731_v12  ;;  %v671_v21 = vpack.c.bf16 %v60_v19, %v52_v18  ;;  %670 = vmatprep.subr.bf16.mxu0 %v669_v16  ;;  %v735_v25 = vpack.c.bf16 %v62_v22, %v54_v20  ;;  %v673_v26 = vpack.c.bf16 %v77_v24, %v69_v23  ;;  %v71_v27 = vld [vmem:[%s1754_s1 + $0x118] sm:$0xff]  ;;  %v68_v29 = vld [vmem:[%s1754_s1 + $0x100] sm:$0xff]  ;;  %v70_v32 = vld [vmem:[%s1754_s1 + $0x110] sm:$0xff] }
   0x8   :  { %734 = vmatprep.subr.bf16.mxu1 %v733_v17  ;;  %v79_v28 = vld [vmem:[%s1754_s1 + $0x158] sm:$0xff]  ;;  %v76_v31 = vld [vmem:[%s1754_s1 + $0x140] sm:$0xff]  ;;  %v78_v33 = vld [vmem:[%s1754_s1 + $0x150] sm:$0xff] }
   0x9   :  { %v737_v30 = vpack.c.bf16 %v79_v28, %v71_v27  ;;  %v675_v34 = vpack.c.bf16 %v76_v31, %v68_v29  ;;  %v85_v35 = vld [vmem:[%s1754_s1 + $0x188] sm:$0xff]  ;;  %v87_v37 = vld [vmem:[%s1754_s1 + $0x198] sm:$0xff]  ;;  %v739_v38 = vpack.c.bf16 %v78_v33, %v70_v32  ;;  %v84_v41 = vld [vmem:[%s1754_s1 + $0x180] sm:$0xff] }
   0xa   :  { %672 = vmatpush1.bf16.msra.mxu0 %v671_v21  ;;  %v93_v36 = vld [vmem:[%s1754_s1 + $0x1c8] sm:$0xff]  ;;  %v95_v40 = vld [vmem:[%s1754_s1 + $0x1d8] sm:$0xff]  ;;  %v92_v42 = vld [vmem:[%s1754_s1 + $0x1c0] sm:$0xff] }
   0xb   :  { %736 = vmatpush1.bf16.msra.mxu1 %v735_v25  ;;  %674 = vmatprep.subr.bf16.mxu0 %v673_v26  ;;  %v677_v39 = vpack.c.bf16 %v93_v36, %v85_v35  ;;  %v741_v43 = vpack.c.bf16 %v95_v40, %v87_v37  ;;  %v86_v44 = vld [vmem:[%s1754_s1 + $0x190] sm:$0xff]  ;;  %v101_v46 = vld [vmem:[%s1754_s1 + $0x208] sm:$0xff]  ;;  %v103_v48 = vld [vmem:[%s1754_s1 + $0x218] sm:$0xff]  ;;  %v679_v50 = vpack.c.bf16 %v92_v42, %v84_v41 }
   0xc   :  { %738 = vmatprep.subr.bf16.mxu1 %v737_v30  ;;  %v94_v45 = vld [vmem:[%s1754_s1 + $0x1d0] sm:$0xff]  ;;  %v109_v47 = vld [vmem:[%s1754_s1 + $0x248] sm:$0xff]  ;;  %v111_v49 = vld [vmem:[%s1754_s1 + $0x258] sm:$0xff] }
   0xd   :  { %v743_v51 = vpack.c.bf16 %v94_v45, %v86_v44  ;;  %v681_v52 = vpack.c.bf16 %v109_v47, %v101_v46  ;;  %v100_v53 = vld [vmem:[%s1754_s1 + $0x200] sm:$0xff]  ;;  %v102_v55 = vld [vmem:[%s1754_s1 + $0x210] sm:$0xff]  ;;  %v745_v56 = vpack.c.bf16 %v111_v49, %v103_v48  ;;  %v117_v58 = vld [vmem:[%s1754_s1 + $0x288] sm:$0xff] }
   0xe   :  { %676 = vmatpush1.bf16.msra.mxu0 %v675_v34  ;;  %v108_v54 = vld [vmem:[%s1754_s1 + $0x240] sm:$0xff]  ;;  %v110_v57 = vld [vmem:[%s1754_s1 + $0x250] sm:$0xff]  ;;  %v125_v59 = vld [vmem:[%s1754_s1 + $0x2c8] sm:$0xff] }
   0xf   :  { %740 = vmatpush1.bf16.msra.mxu1 %v739_v38  ;;  %678 = vmatprep.subr.bf16.mxu0 %v677_v39  ;;  %v119_v60 = vld [vmem:[%s1754_s1 + $0x298] sm:$0xff]  ;;  %v683_v62 = vpack.c.bf16 %v108_v54, %v100_v53  ;;  %v747_v63 = vpack.c.bf16 %v110_v57, %v102_v55  ;;  %v685_v0 = vpack.c.bf16 %v125_v59, %v117_v58  ;;  %v116_v1 = vld [vmem:[%s1754_s1 + $0x280] sm:$0xff]  ;;  %v118_v3 = vld [vmem:[%s1754_s1 + $0x290] sm:$0xff] }
  0x10   :  { %742 = vmatprep.subr.bf16.mxu1 %v741_v43  ;;  %v127_v61 = vld [vmem:[%s1754_s1 + $0x2d8] sm:$0xff]  ;;  %v124_v2 = vld [vmem:[%s1754_s1 + $0x2c0] sm:$0xff]  ;;  %v126_v5 = vld [vmem:[%s1754_s1 + $0x2d0] sm:$0xff] }
  0x11   :  { %v749_v4 = vpack.c.bf16 %v127_v61, %v119_v60  ;;  %v133_v6 = vld [vmem:[%s1754_s1 + $0x308] sm:$0xff]  ;;  %v135_v8 = vld [vmem:[%s1754_s1 + $0x318] sm:$0xff]  ;;  %v687_v10 = vpack.c.bf16 %v124_v2, %v116_v1  ;;  %v751_v11 = vpack.c.bf16 %v126_v5, %v118_v3  ;;  %v132_v13 = vld [vmem:[%s1754_s1 + $0x300] sm:$0xff] }
  0x12   :  { %680 = vmatpush1.bf16.msra.mxu0 %v679_v50  ;;  %v141_v7 = vld [vmem:[%s1754_s1 + $0x348] sm:$0xff]  ;;  %v143_v9 = vld [vmem:[%s1754_s1 + $0x358] sm:$0xff]  ;;  %v140_v14 = vld [vmem:[%s1754_s1 + $0x340] sm:$0xff] }
  0x13   :  { %744 = vmatpush1.bf16.msra.mxu1 %v743_v51  ;;  %682 = vmatprep.subr.bf16.mxu0 %v681_v52  ;;  %v689_v12 = vpack.c.bf16 %v141_v7, %v133_v6  ;;  %v134_v15 = vld [vmem:[%s1754_s1 + $0x310] sm:$0xff]  ;;  %v753_v16 = vpack.c.bf16 %v143_v9, %v135_v8  ;;  %v149_v18 = vld [vmem:[%s1754_s1 + $0x388] sm:$0xff]  ;;  %v151_v20 = vld [vmem:[%s1754_s1 + $0x398] sm:$0xff]  ;;  %v691_v22 = vpack.c.bf16 %v140_v14, %v132_v13 }
  0x14   :  { %746 = vmatprep.subr.bf16.mxu1 %v745_v56  ;;  %v142_v17 = vld [vmem:[%s1754_s1 + $0x350] sm:$0xff]  ;;  %v157_v19 = vld [vmem:[%s1754_s1 + $0x3c8] sm:$0xff]  ;;  %v159_v21 = vld [vmem:[%s1754_s1 + $0x3d8] sm:$0xff] }
  0x15   :  { %v755_v23 = vpack.c.bf16 %v142_v17, %v134_v15  ;;  %v693_v24 = vpack.c.bf16 %v157_v19, %v149_v18  ;;  %v148_v25 = vld [vmem:[%s1754_s1 + $0x380] sm:$0xff]  ;;  %v150_v27 = vld [vmem:[%s1754_s1 + $0x390] sm:$0xff]  ;;  %v757_v28 = vpack.c.bf16 %v159_v21, %v151_v20  ;;  %v165_v30 = vld [vmem:[%s1754_s1 + $0x408] sm:$0xff] }
  0x16   :  { %684 = vmatpush1.bf16.msra.mxu0 %v683_v62  ;;  %v156_v26 = vld [vmem:[%s1754_s1 + $0x3c0] sm:$0xff]  ;;  %v158_v29 = vld [vmem:[%s1754_s1 + $0x3d0] sm:$0xff]  ;;  %v173_v31 = vld [vmem:[%s1754_s1 + $0x448] sm:$0xff] }
  0x17   :  { %748 = vmatpush1.bf16.msra.mxu1 %v747_v63  ;;  %686 = vmatprep.subr.bf16.mxu0 %v685_v0  ;;  %v167_v32 = vld [vmem:[%s1754_s1 + $0x418] sm:$0xff]  ;;  %v695_v34 = vpack.c.bf16 %v156_v26, %v148_v25  ;;  %v759_v35 = vpack.c.bf16 %v158_v29, %v150_v27  ;;  %v697_v36 = vpack.c.bf16 %v173_v31, %v165_v30  ;;  %v164_v37 = vld [vmem:[%s1754_s1 + $0x400] sm:$0xff]  ;;  %v166_v39 = vld [vmem:[%s1754_s1 + $0x410] sm:$0xff] }
  0x18   :  { %750 = vmatprep.subr.bf16.mxu1 %v749_v4  ;;  %v175_v33 = vld [vmem:[%s1754_s1 + $0x458] sm:$0xff]  ;;  %v172_v38 = vld [vmem:[%s1754_s1 + $0x440] sm:$0xff]  ;;  %v174_v41 = vld [vmem:[%s1754_s1 + $0x450] sm:$0xff] }
  0x19   :  { %v761_v40 = vpack.c.bf16 %v175_v33, %v167_v32  ;;  %v181_v42 = vld [vmem:[%s1754_s1 + $0x488] sm:$0xff]  ;;  %v183_v44 = vld [vmem:[%s1754_s1 + $0x498] sm:$0xff]  ;;  %v699_v46 = vpack.c.bf16 %v172_v38, %v164_v37  ;;  %v763_v47 = vpack.c.bf16 %v174_v41, %v166_v39  ;;  %v180_v49 = vld [vmem:[%s1754_s1 + $0x480] sm:$0xff] }
  0x1a   :  { %688 = vmatpush1.bf16.msra.mxu0 %v687_v10  ;;  %v189_v43 = vld [vmem:[%s1754_s1 + $0x4c8] sm:$0xff]  ;;  %v191_v45 = vld [vmem:[%s1754_s1 + $0x4d8] sm:$0xff]  ;;  %v188_v50 = vld [vmem:[%s1754_s1 + $0x4c0] sm:$0xff] }
  0x1b   :  { %752 = vmatpush1.bf16.msra.mxu1 %v751_v11  ;;  %690 = vmatprep.subr.bf16.mxu0 %v689_v12  ;;  %v701_v48 = vpack.c.bf16 %v189_v43, %v181_v42  ;;  %v182_v51 = vld [vmem:[%s1754_s1 + $0x490] sm:$0xff]  ;;  %v765_v52 = vpack.c.bf16 %v191_v45, %v183_v44  ;;  %v197_v54 = vld [vmem:[%s1754_s1 + $0x508] sm:$0xff]  ;;  %v199_v56 = vld [vmem:[%s1754_s1 + $0x518] sm:$0xff]  ;;  %v703_v58 = vpack.c.bf16 %v188_v50, %v180_v49 }
  0x1c   :  { %754 = vmatprep.subr.bf16.mxu1 %v753_v16  ;;  %v190_v53 = vld [vmem:[%s1754_s1 + $0x4d0] sm:$0xff]  ;;  %v205_v55 = vld [vmem:[%s1754_s1 + $0x548] sm:$0xff]  ;;  %v207_v57 = vld [vmem:[%s1754_s1 + $0x558] sm:$0xff] }
  0x1d   :  { %v767_v59 = vpack.c.bf16 %v190_v53, %v182_v51  ;;  %v705_v60 = vpack.c.bf16 %v205_v55, %v197_v54  ;;  %v196_v61 = vld [vmem:[%s1754_s1 + $0x500] sm:$0xff]  ;;  %v198_v63 = vld [vmem:[%s1754_s1 + $0x510] sm:$0xff]  ;;  %v769_v0 = vpack.c.bf16 %v207_v57, %v199_v56  ;;  %v213_v2 = vld [vmem:[%s1754_s1 + $0x588] sm:$0xff] }
  0x1e   :  { %692 = vmatpush1.bf16.msra.mxu0 %v691_v22  ;;  %v204_v62 = vld [vmem:[%s1754_s1 + $0x540] sm:$0xff]  ;;  %v206_v1 = vld [vmem:[%s1754_s1 + $0x550] sm:$0xff]  ;;  %v221_v3 = vld [vmem:[%s1754_s1 + $0x5c8] sm:$0xff] }
  0x1f   :  { %756 = vmatpush1.bf16.msra.mxu1 %v755_v23  ;;  %694 = vmatprep.subr.bf16.mxu0 %v693_v24  ;;  %v215_v4 = vld [vmem:[%s1754_s1 + $0x598] sm:$0xff]  ;;  %v707_v6 = vpack.c.bf16 %v204_v62, %v196_v61  ;;  %v212_v7 = vld [vmem:[%s1754_s1 + $0x580] sm:$0xff]  ;;  %v771_v8 = vpack.c.bf16 %v206_v1, %v198_v63  ;;  %v709_v9 = vpack.c.bf16 %v221_v3, %v213_v2  ;;  %v214_v11 = vld [vmem:[%s1754_s1 + $0x590] sm:$0xff] }
  0x20   :  { %758 = vmatprep.subr.bf16.mxu1 %v757_v28  ;;  %v223_v5 = vld [vmem:[%s1754_s1 + $0x5d8] sm:$0xff]  ;;  %v220_v10 = vld [vmem:[%s1754_s1 + $0x5c0] sm:$0xff]  ;;  %v222_v12 = vld [vmem:[%s1754_s1 + $0x5d0] sm:$0xff] }
  0x21   :  { %v773_v13 = vpack.c.bf16 %v223_v5, %v215_v4  ;;  %v229_v14 = vld [vmem:[%s1754_s1 + $0x608] sm:$0xff]  ;;  %v231_v17 = vld [vmem:[%s1754_s1 + $0x618] sm:$0xff]  ;;  %v711_v19 = vpack.c.bf16 %v220_v10, %v212_v7  ;;  %v775_v20 = vpack.c.bf16 %v222_v12, %v214_v11  ;;  %v228_v22 = vld [vmem:[%s1754_s1 + $0x600] sm:$0xff] }
  0x22   :  { %696 = vmatpush1.bf16.msra.mxu0 %v695_v34  ;;  %v237_v15 = vld [vmem:[%s1754_s1 + $0x648] sm:$0xff]  ;;  %v239_v18 = vld [vmem:[%s1754_s1 + $0x658] sm:$0xff]  ;;  %v236_v23 = vld [vmem:[%s1754_s1 + $0x640] sm:$0xff] }
  0x23   :  { %760 = vmatpush1.bf16.msra.mxu1 %v759_v35  ;;  %698 = vmatprep.subr.bf16.mxu0 %v697_v36  ;;  %v1238_v16 = vld [vmem:[%s1755_s0 + $0x8] sm:$0xff]  ;;  %v713_v21 = vpack.c.bf16 %v237_v15, %v229_v14  ;;  %v230_v24 = vld [vmem:[%s1754_s1 + $0x610] sm:$0xff]  ;;  %v777_v25 = vpack.c.bf16 %v239_v18, %v231_v17  ;;  %v247_v29 = vld [vmem:[%s1754_s1 + $0x698] sm:$0xff]  ;;  %v715_v31 = vpack.c.bf16 %v236_v23, %v228_v22 }
  0x24   :  { %762 = vmatprep.subr.bf16.mxu1 %v761_v40  ;;  %356 = vmatprep.mubr.f32.mxu0 %v1238_v16  ;;  %v238_v26 = vld [vmem:[%s1754_s1 + $0x650] sm:$0xff]  ;;  %v245_v27 = vld [vmem:[%s1754_s1 + $0x688] sm:$0xff]  ;;  %v255_v30 = vld [vmem:[%s1754_s1 + $0x6d8] sm:$0xff] }
  0x25   :  { %427 = vmatprep.mubr.f32.mxu1 %v1238_v16  ;;  %v253_v28 = vld [vmem:[%s1754_s1 + $0x6c8] sm:$0xff]  ;;  %v779_v32 = vpack.c.bf16 %v238_v26, %v230_v24  ;;  %v244_v34 = vld [vmem:[%s1754_s1 + $0x680] sm:$0xff]  ;;  %v246_v36 = vld [vmem:[%s1754_s1 + $0x690] sm:$0xff]  ;;  %v781_v37 = vpack.c.bf16 %v255_v30, %v247_v29 }
  0x26   :  { %700 = vmatpush1.bf16.msra.mxu0 %v699_v46  ;;  %v717_v33 = vpack.c.bf16 %v253_v28, %v245_v27  ;;  %v252_v35 = vld [vmem:[%s1754_s1 + $0x6c0] sm:$0xff]  ;;  %v254_v38 = vld [vmem:[%s1754_s1 + $0x6d0] sm:$0xff]  ;;  %v261_v39 = vld [vmem:[%s1754_s1 + $0x708] sm:$0xff] }
  0x27   :  { %764 = vmatpush1.bf16.msra.mxu1 %v763_v47  ;;  %702 = vmatprep.subr.bf16.mxu0 %v701_v48  ;;  %v269_v40 = vld [vmem:[%s1754_s1 + $0x748] sm:$0xff]  ;;  %v263_v41 = vld [vmem:[%s1754_s1 + $0x718] sm:$0xff]  ;;  %v719_v43 = vpack.c.bf16 %v252_v35, %v244_v34  ;;  %v783_v44 = vpack.c.bf16 %v254_v38, %v246_v36  ;;  %v260_v46 = vld [vmem:[%s1754_s1 + $0x700] sm:$0xff] }
  0x28   :  { %766 = vmatprep.subr.bf16.mxu1 %v765_v52  ;;  %v271_v42 = vld [vmem:[%s1754_s1 + $0x758] sm:$0xff]  ;;  %v721_v45 = vpack.c.bf16 %v269_v40, %v261_v39  ;;  %v268_v47 = vld [vmem:[%s1754_s1 + $0x740] sm:$0xff]  ;;  %v262_v48 = vld [vmem:[%s1754_s1 + $0x710] sm:$0xff] }
  0x29   :  { %v785_v49 = vpack.c.bf16 %v271_v42, %v263_v41  ;;  %v270_v50 = vld [vmem:[%s1754_s1 + $0x750] sm:$0xff]  ;;  %v277_v51 = vld [vmem:[%s1754_s1 + $0x788] sm:$0xff]  ;;  %v279_v53 = vld [vmem:[%s1754_s1 + $0x798] sm:$0xff]  ;;  %v723_v55 = vpack.c.bf16 %v268_v47, %v260_v46 }
  0x2a   :  { %704 = vmatpush1.bf16.msra.mxu0 %v703_v58  ;;  %v285_v52 = vld [vmem:[%s1754_s1 + $0x7c8] sm:$0xff]  ;;  %v287_v54 = vld [vmem:[%s1754_s1 + $0x7d8] sm:$0xff]  ;;  %v787_v56 = vpack.c.bf16 %v270_v50, %v262_v48  ;;  %v276_v58 = vld [vmem:[%s1754_s1 + $0x780] sm:$0xff] }
  0x2b   :  { %768 = vmatpush1.bf16.msra.mxu1 %v767_v59  ;;  %706 = vmatprep.subr.bf16.mxu0 %v705_v60  ;;  %v725_v57 = vpack.c.bf16 %v285_v52, %v277_v51  ;;  %v284_v59 = vld [vmem:[%s1754_s1 + $0x7c0] sm:$0xff]  ;;  %v278_v60 = vld [vmem:[%s1754_s1 + $0x790] sm:$0xff]  ;;  %v789_v61 = vpack.c.bf16 %v287_v54, %v279_v53  ;;  %v41_v63 = vld [vmem:[%s1754_s1 + $0x28] sm:$0xff] }
  0x2c   :  { %770 = vmatprep.subr.bf16.mxu1 %v769_v0  ;;  %v286_v62 = vld [vmem:[%s1754_s1 + $0x7d0] sm:$0xff]  ;;  %v49_v0 = vld [vmem:[%s1754_s1 + $0x68] sm:$0xff]  ;;  %v43_v1 = vld [vmem:[%s1754_s1 + $0x38] sm:$0xff]  ;;  %v727_v3 = vpack.c.bf16 %v284_v59, %v276_v58 }
  0x2d   :  { %v51_v2 = vld [vmem:[%s1754_s1 + $0x78] sm:$0xff]  ;;  %v791_v4 = vpack.c.bf16 %v286_v62, %v278_v60  ;;  %v793_v5 = vpack.c.bf16 %v49_v0, %v41_v63  ;;  %v48_v7 = vld [vmem:[%s1754_s1 + $0x60] sm:$0xff]  ;;  %v50_v10 = vld [vmem:[%s1754_s1 + $0x70] sm:$0xff] }
  0x2e   :  { %708 = vmatpush1.bf16.msra.mxu0 %v707_v6  ;;  %v40_v6 = vld [vmem:[%s1754_s1 + $0x20] sm:$0xff]  ;;  %v57_v11 = vld [vmem:[%s1754_s1 + $0xa8] sm:$0xff]  ;;  %v67_v14 = vld [vmem:[%s1754_s1 + $0xf8] sm:$0xff] }
  0x2f   :  { %772 = vmatpush1.bf16.msra.mxu1 %v771_v8  ;;  %710 = vmatprep.subr.bf16.mxu0 %v709_v9  ;;  %v42_v8 = vld [vmem:[%s1754_s1 + $0x30] sm:$0xff]  ;;  %v857_v9 = vpack.c.bf16 %v51_v2, %v43_v1  ;;  %v65_v12 = vld [vmem:[%s1754_s1 + $0xe8] sm:$0xff]  ;;  %v1371_v15 = vld [vmem:[%s1755_s0] sm:$0xff]  ;;  %v795_v17 = vpack.c.bf16 %v48_v7, %v40_v6 }
  0x30   :  { %774 = vmatprep.subr.bf16.mxu1 %v773_v13  ;;  %v59_v13 = vld [vmem:[%s1754_s1 + $0xb8] sm:$0xff]  ;;  %v859_v18 = vpack.c.bf16 %v50_v10, %v42_v8  ;;  %v58_v22 = vld [vmem:[%s1754_s1 + $0xb0] sm:$0xff]  ;;  %v81_v26 = vld [vmem:[%s1754_s1 + $0x168] sm:$0xff] }
  0x31   :  { %v861_v23 = vpack.c.bf16 %v67_v14, %v59_v13  ;;  %v66_v24 = vld [vmem:[%s1754_s1 + $0xf0] sm:$0xff]  ;;  %v75_v27 = vld [vmem:[%s1754_s1 + $0x138] sm:$0xff]  ;;  %v97_v38 = vld [vmem:[%s1754_s1 + $0x1e8] sm:$0xff] }
  0x32   :  { %712 = vmatpush1.bf16.msra.mxu0 %v711_v19  ;;  %v797_v19 = vpack.c.bf16 %v65_v12, %v57_v11  ;;  %v83_v28 = vld [vmem:[%s1754_s1 + $0x178] sm:$0xff]  ;;  %v863_v30 = vpack.c.bf16 %v66_v24, %v58_v22  ;;  %v74_v34 = vld [vmem:[%s1754_s1 + $0x130] sm:$0xff]  ;;  %v105_v48 = vld [vmem:[%s1754_s1 + $0x228] sm:$0xff] }
  0x33   :  { %776 = vmatpush1.bf16.msra.mxu1 %v775_v20  ;;  %714 = vmatprep.subr.bf16.mxu0 %v713_v21  ;;  %v56_v20 = vld [vmem:[%s1754_s1 + $0xa0] sm:$0xff]  ;;  %v865_v35 = vpack.c.bf16 %v83_v28, %v75_v27  ;;  %v82_v36 = vld [vmem:[%s1754_s1 + $0x170] sm:$0xff]  ;;  %v91_v39 = vld [vmem:[%s1754_s1 + $0x1b8] sm:$0xff] }
  0x34   :  { %778 = vmatprep.subr.bf16.mxu1 %v777_v25  ;;  %v64_v21 = vld [vmem:[%s1754_s1 + $0xe0] sm:$0xff]  ;;  %v73_v25 = vld [vmem:[%s1754_s1 + $0x128] sm:$0xff]  ;;  %v99_v40 = vld [vmem:[%s1754_s1 + $0x1f8] sm:$0xff]  ;;  %v867_v42 = vpack.c.bf16 %v82_v36, %v74_v34 }
  0x35   :  { %v799_v29 = vpack.c.bf16 %v64_v21, %v56_v20  ;;  %v90_v46 = vld [vmem:[%s1754_s1 + $0x1b0] sm:$0xff]  ;;  %v107_v50 = vld [vmem:[%s1754_s1 + $0x238] sm:$0xff]  ;;  %v121_v60 = vld [vmem:[%s1754_s1 + $0x2a8] sm:$0xff] }
  0x36   :  { %716 = vmatpush1.bf16.msra.mxu0 %v715_v31  ;;  %v801_v31 = vpack.c.bf16 %v81_v26, %v73_v25  ;;  %v98_v47 = vld [vmem:[%s1754_s1 + $0x1f0] sm:$0xff]  ;;  %v115_v51 = vld [vmem:[%s1754_s1 + $0x278] sm:$0xff]  ;;  %v137_v8 = vld [vmem:[%s1754_s1 + $0x328] sm:$0xff] }
  0x37   :  { %780 = vmatpush1.bf16.msra.mxu1 %v779_v32  ;;  %718 = vmatprep.subr.bf16.mxu0 %v717_v33  ;;  %v72_v32 = vld [vmem:[%s1754_s1 + $0x120] sm:$0xff]  ;;  %v871_v53 = vpack.c.bf16 %v98_v47, %v90_v46  ;;  %v873_v58 = vpack.c.bf16 %v115_v51, %v107_v50  ;;  %v114_v59 = vld [vmem:[%s1754_s1 + $0x270] sm:$0xff]  ;;  %v123_v62 = vld [vmem:[%s1754_s1 + $0x2b8] sm:$0xff] }
  0x38   :  { %782 = vmatprep.subr.bf16.mxu1 %v781_v37  ;;  %v80_v33 = vld [vmem:[%s1754_s1 + $0x160] sm:$0xff]  ;;  %v89_v37 = vld [vmem:[%s1754_s1 + $0x1a8] sm:$0xff]  ;;  %v131_v63 = vld [vmem:[%s1754_s1 + $0x2f8] sm:$0xff] }
  0x39   :  { %v803_v41 = vpack.c.bf16 %v80_v33, %v72_v32  ;;  %v877_v6 = vpack.c.bf16 %v131_v63, %v123_v62  ;;  %v130_v7 = vld [vmem:[%s1754_s1 + $0x2f0] sm:$0xff]  ;;  %v139_v10 = vld [vmem:[%s1754_s1 + $0x338] sm:$0xff]  ;;  %v153_v22 = vld [vmem:[%s1754_s1 + $0x3a8] sm:$0xff] }
  0x3a   :  { %720 = vmatpush1.bf16.msra.mxu0 %v719_v43  ;;  %v805_v43 = vpack.c.bf16 %v97_v38, %v89_v37  ;;  %v147_v11 = vld [vmem:[%s1754_s1 + $0x378] sm:$0xff]  ;;  %v146_v21 = vld [vmem:[%s1754_s1 + $0x370] sm:$0xff]  ;;  %v169_v34 = vld [vmem:[%s1754_s1 + $0x428] sm:$0xff] }
  0x3b   :  { %784 = vmatpush1.bf16.msra.mxu1 %v783_v44  ;;  %722 = vmatprep.subr.bf16.mxu0 %v721_v45  ;;  %v88_v44 = vld [vmem:[%s1754_s1 + $0x1a0] sm:$0xff]  ;;  %v881_v20 = vpack.c.bf16 %v147_v11, %v139_v10  ;;  %v155_v24 = vld [vmem:[%s1754_s1 + $0x3b8] sm:$0xff]  ;;  %v162_v33 = vld [vmem:[%s1754_s1 + $0x3f0] sm:$0xff] }
  0x3c   :  { %786 = vmatprep.subr.bf16.mxu1 %v785_v49  ;;  %v96_v45 = vld [vmem:[%s1754_s1 + $0x1e0] sm:$0xff]  ;;  %v113_v49 = vld [vmem:[%s1754_s1 + $0x268] sm:$0xff]  ;;  %v163_v25 = vld [vmem:[%s1754_s1 + $0x3f8] sm:$0xff] }
  0x3d   :  { %v807_v52 = vpack.c.bf16 %v96_v45, %v88_v44  ;;  %v809_v54 = vpack.c.bf16 %v113_v49, %v105_v48  ;;  %v885_v32 = vpack.c.bf16 %v163_v25, %v155_v24  ;;  %v171_v36 = vld [vmem:[%s1754_s1 + $0x438] sm:$0xff]  ;;  %v178_v45 = vld [vmem:[%s1754_s1 + $0x470] sm:$0xff]  ;;  %v185_v46 = vld [vmem:[%s1754_s1 + $0x4a8] sm:$0xff] }
  0x3e   :  { %724 = vmatpush1.bf16.msra.mxu0 %v723_v55  ;;  %v104_v55 = vld [vmem:[%s1754_s1 + $0x220] sm:$0xff]  ;;  %v179_v37 = vld [vmem:[%s1754_s1 + $0x478] sm:$0xff] }
  0x3f   :  { %788 = vmatpush1.bf16.msra.mxu1 %v787_v56  ;;  %726 = vmatprep.subr.bf16.mxu0 %v725_v57  ;;  %v112_v56 = vld [vmem:[%s1754_s1 + $0x260] sm:$0xff]  ;;  %v106_v57 = vld [vmem:[%s1754_s1 + $0x230] sm:$0xff]  ;;  %v889_v44 = vpack.c.bf16 %v179_v37, %v171_v36  ;;  %v187_v47 = vld [vmem:[%s1754_s1 + $0x4b8] sm:$0xff] }
  0x40   :  { %790 = vmatprep.subr.bf16.mxu1 %v789_v61  ;;  %v129_v61 = vld [vmem:[%s1754_s1 + $0x2e8] sm:$0xff]  ;;  %v811_v0 = vpack.c.bf16 %v112_v56, %v104_v55  ;;  %v875_v1 = vpack.c.bf16 %v114_v59, %v106_v57  ;;  %v195_v48 = vld [vmem:[%s1754_s1 + $0x4f8] sm:$0xff]  ;;  %v194_v56 = vld [vmem:[%s1754_s1 + $0x4f0] sm:$0xff] }
  0x41   :  { %v813_v2 = vpack.c.bf16 %v129_v61, %v121_v60  ;;  %v893_v55 = vpack.c.bf16 %v195_v48, %v187_v47  ;;  %v201_v57 = vld [vmem:[%s1754_s1 + $0x528] sm:$0xff]  ;;  %v203_v59 = vld [vmem:[%s1754_s1 + $0x538] sm:$0xff] }
  0x42   :  { %728 = vmatpush1.bf16.msra.mxu0 %v727_v3  ;;  %v120_v3 = vld [vmem:[%s1754_s1 + $0x2a0] sm:$0xff]  ;;  %v211_v60 = vld [vmem:[%s1754_s1 + $0x578] sm:$0xff] }
  0x43   :  { %792 = vmatpush1.bf16.msra.mxu1 %v791_v4  ;;  %794 = vmatprep.subr.bf16.mxu0 %v793_v5  ;;  %v128_v4 = vld [vmem:[%s1754_s1 + $0x2e0] sm:$0xff]  ;;  %v122_v5 = vld [vmem:[%s1754_s1 + $0x2b0] sm:$0xff] }
  0x44   :  { %858 = vmatprep.subr.bf16.mxu1 %v857_v9  ;;  %v145_v9 = vld [vmem:[%s1754_s1 + $0x368] sm:$0xff]  ;;  %v815_v12 = vpack.c.bf16 %v128_v4, %v120_v3  ;;  %v879_v13 = vpack.c.bf16 %v130_v7, %v122_v5  ;;  %v897_v3 = vpack.c.bf16 %v211_v60, %v203_v59  ;;  %v210_v4 = vld [vmem:[%s1754_s1 + $0x570] sm:$0xff]  ;;  %v219_v7 = vld [vmem:[%s1754_s1 + $0x5b8] sm:$0xff] }
  0x45   :  { %357 = vmatmul.mubr.f32.vlgmr.msra.gmra.mrb[0].mxu0 %v1371_v15  ;;  %v817_v14 = vpack.c.bf16 %v145_v9, %v137_v8  ;;  %v217_v5 = vld [vmem:[%s1754_s1 + $0x5a8] sm:$0xff]  ;;  %v227_v8 = vld [vmem:[%s1754_s1 + $0x5f8] sm:$0xff] }
  0x46   :  { %428 = vmatmul.mubr.f32.vlgmr.msra.gmra.mrb[0].mxu1 %v1371_v15  ;;  %796 = vmatpush1.bf16.msra.mxu0 %v795_v17  ;;  %v136_v17 = vld [vmem:[%s1754_s1 + $0x320] sm:$0xff] }
  0x47   :  { %860 = vmatpush1.bf16.msra.mxu1 %v859_v18  ;;  %798 = vmatprep.subr.bf16.mxu0 %v797_v19  ;;  %v144_v18 = vld [vmem:[%s1754_s1 + $0x360] sm:$0xff]  ;;  %v138_v19 = vld [vmem:[%s1754_s1 + $0x330] sm:$0xff] }
  0x48   :  { %862 = vmatprep.subr.bf16.mxu1 %v861_v23  ;;  %498 = vmatprep.mubr.f32.mxu0 %v1238_v16  ;;  %v161_v23 = vld [vmem:[%s1754_s1 + $0x3e8] sm:$0xff]  ;;  %v819_v26 = vpack.c.bf16 %v144_v18, %v136_v17  ;;  %v883_v27 = vpack.c.bf16 %v146_v21, %v138_v19  ;;  %v901_v17 = vpack.c.bf16 %v227_v8, %v219_v7  ;;  %v226_v18 = vld [vmem:[%s1754_s1 + $0x5f0] sm:$0xff]  ;;  %v235_v21 = vld [vmem:[%s1754_s1 + $0x638] sm:$0xff] }
  0x49   :  { %569 = vmatprep.mubr.f32.mxu1 %v1238_v16  ;;  %v869_v16 = vpack.c.bf16 %v99_v40, %v91_v39  ;;  %v821_v28 = vpack.c.bf16 %v161_v23, %v153_v22  ;;  %v233_v19 = vld [vmem:[%s1754_s1 + $0x628] sm:$0xff]  ;;  %v243_v22 = vld [vmem:[%s1754_s1 + $0x678] sm:$0xff]  ;;  %v603_v8 = vld [vmem:[%s1756_s2] sm:$0xff] }
  0x4a   :  { %800 = vmatpush1.bf16.msra.mxu0 %v799_v29  ;;  %v152_v29 = vld [vmem:[%s1754_s1 + $0x3a0] sm:$0xff] }
  0x4b   :  { %864 = vmatpush1.bf16.msra.mxu1 %v863_v30  ;;  %802 = vmatprep.subr.bf16.mxu0 %v801_v31  ;;  %v160_v30 = vld [vmem:[%s1754_s1 + $0x3e0] sm:$0xff]  ;;  %v154_v31 = vld [vmem:[%s1754_s1 + $0x3b0] sm:$0xff] }
  0x4c   :  { %866 = vmatprep.subr.bf16.mxu1 %v865_v35  ;;  %v177_v35 = vld [vmem:[%s1754_s1 + $0x468] sm:$0xff]  ;;  %v823_v38 = vpack.c.bf16 %v160_v30, %v152_v29  ;;  %v887_v39 = vpack.c.bf16 %v162_v33, %v154_v31  ;;  %v905_v29 = vpack.c.bf16 %v243_v22, %v235_v21  ;;  %v242_v30 = vld [vmem:[%s1754_s1 + $0x670] sm:$0xff]  ;;  %v251_v33 = vld [vmem:[%s1754_s1 + $0x6b8] sm:$0xff] }
  0x4d   :  { %v825_v40 = vpack.c.bf16 %v177_v35, %v169_v34  ;;  %v249_v31 = vld [vmem:[%s1754_s1 + $0x6a8] sm:$0xff]  ;;  %v259_v34 = vld [vmem:[%s1754_s1 + $0x6f8] sm:$0xff] }
  0x4e   :  { %804 = vmatpush1.bf16.msra.mxu0 %v803_v41  ;;  %v168_v41 = vld [vmem:[%s1754_s1 + $0x420] sm:$0xff] }
  0x4f   :  { %868 = vmatpush1.bf16.msra.mxu1 %v867_v42  ;;  %806 = vmatprep.subr.bf16.mxu0 %v805_v43  ;;  %v176_v42 = vld [vmem:[%s1754_s1 + $0x460] sm:$0xff]  ;;  %v170_v43 = vld [vmem:[%s1754_s1 + $0x430] sm:$0xff] }
  0x50   :  { %870 = vmatprep.subr.bf16.mxu1 %v869_v16  ;;  %v193_v16 = vld [vmem:[%s1754_s1 + $0x4e8] sm:$0xff]  ;;  %v827_v49 = vpack.c.bf16 %v176_v42, %v168_v41  ;;  %v891_v50 = vpack.c.bf16 %v178_v45, %v170_v43  ;;  %v909_v41 = vpack.c.bf16 %v259_v34, %v251_v33  ;;  %v258_v42 = vld [vmem:[%s1754_s1 + $0x6f0] sm:$0xff]  ;;  %v267_v45 = vld [vmem:[%s1754_s1 + $0x738] sm:$0xff] }
  0x51   :  { %v829_v51 = vpack.c.bf16 %v193_v16, %v185_v46  ;;  %v265_v43 = vld [vmem:[%s1754_s1 + $0x728] sm:$0xff]  ;;  %v275_v46 = vld [vmem:[%s1754_s1 + $0x778] sm:$0xff] }
  0x52   :  { %808 = vmatpush1.bf16.msra.mxu0 %v807_v52  ;;  %v184_v52 = vld [vmem:[%s1754_s1 + $0x4a0] sm:$0xff] }
  0x53   :  { %872 = vmatpush1.bf16.msra.mxu1 %v871_v53  ;;  %810 = vmatprep.subr.bf16.mxu0 %v809_v54  ;;  %v192_v53 = vld [vmem:[%s1754_s1 + $0x4e0] sm:$0xff]  ;;  %v186_v54 = vld [vmem:[%s1754_s1 + $0x4b0] sm:$0xff] }
  0x54   :  { %874 = vmatprep.subr.bf16.mxu1 %v873_v58  ;;  %v209_v58 = vld [vmem:[%s1754_s1 + $0x568] sm:$0xff]  ;;  %v831_v61 = vpack.c.bf16 %v192_v53, %v184_v52  ;;  %v895_v62 = vpack.c.bf16 %v194_v56, %v186_v54  ;;  %v913_v52 = vpack.c.bf16 %v275_v46, %v267_v45  ;;  %v274_v53 = vld [vmem:[%s1754_s1 + $0x770] sm:$0xff]  ;;  %v283_v56 = vld [vmem:[%s1754_s1 + $0x7b8] sm:$0xff] }
  0x55   :  { %v833_v63 = vpack.c.bf16 %v209_v58, %v201_v57  ;;  %v281_v54 = vld [vmem:[%s1754_s1 + $0x7a8] sm:$0xff]  ;;  %v291_v57 = vld [vmem:[%s1754_s1 + $0x7f8] sm:$0xff] }
  0x56   :  { %812 = vmatpush1.bf16.msra.mxu0 %v811_v0  ;;  %v200_v0 = vld [vmem:[%s1754_s1 + $0x520] sm:$0xff] }
  0x57   :  { %876 = vmatpush1.bf16.msra.mxu1 %v875_v1  ;;  %814 = vmatprep.subr.bf16.mxu0 %v813_v2  ;;  %v208_v1 = vld [vmem:[%s1754_s1 + $0x560] sm:$0xff]  ;;  %v202_v2 = vld [vmem:[%s1754_s1 + $0x530] sm:$0xff] }
  0x58   :  { %878 = vmatprep.subr.bf16.mxu1 %v877_v6  ;;  %v225_v6 = vld [vmem:[%s1754_s1 + $0x5e8] sm:$0xff]  ;;  %v835_v9 = vpack.c.bf16 %v208_v1, %v200_v0  ;;  %v899_v10 = vpack.c.bf16 %v210_v4, %v202_v2  ;;  %v282_v0 = vld [vmem:[%s1754_s1 + $0x7b0] sm:$0xff]  ;;  %v605_v4 = vlaneseq }
  0x59   :  { %v837_v11 = vpack.c.bf16 %v225_v6, %v217_v5  ;;  %v290_v1 = vld [vmem:[%s1754_s1 + $0x7f0] sm:$0xff] }
  0x5a   :  { %816 = vmatpush1.bf16.msra.mxu0 %v815_v12  ;;  %v216_v12 = vld [vmem:[%s1754_s1 + $0x5a0] sm:$0xff]  ;;  %v606_v5 = vshrl.u32 %v605_v4, 7 }
  0x5b   :  { %880 = vmatpush1.bf16.msra.mxu1 %v879_v13  ;;  %818 = vmatprep.subr.bf16.mxu0 %v817_v14  ;;  %v224_v13 = vld [vmem:[%s1754_s1 + $0x5e0] sm:$0xff]  ;;  %v218_v14 = vld [vmem:[%s1754_s1 + $0x5b0] sm:$0xff] }
  0x5c   :  { %882 = vmatprep.subr.bf16.mxu1 %v881_v20  ;;  %v241_v20 = vld [vmem:[%s1754_s1 + $0x668] sm:$0xff]  ;;  %v839_v23 = vpack.c.bf16 %v224_v13, %v216_v12  ;;  %v903_v24 = vpack.c.bf16 %v226_v18, %v218_v14  ;;  %v623_v6 = vsub.s32 4, %v606_v5  ;;  %v631_v7 = vsub.s32 6, %v606_v5 }
  0x5d   :  { %v841_v25 = vpack.c.bf16 %v241_v20, %v233_v19  ;;  %v615_v18 = vsub.s32 2, %v606_v5  ;;  %v611_v19 = vsub.s32 1, %v606_v5  ;;  %v619_v20 = vsub.s32 3, %v606_v5 }
  0x5e   :  { %820 = vmatpush1.bf16.msra.mxu0 %v819_v26  ;;  %v232_v26 = vld [vmem:[%s1754_s1 + $0x620] sm:$0xff]  ;;  %v632_v12 = vrot.slane %v603_v8, %v631_v7 }
  0x5f   :  { %884 = vmatpush1.bf16.msra.mxu1 %v883_v27  ;;  %822 = vmatprep.subr.bf16.mxu0 %v821_v28  ;;  %v240_v27 = vld [vmem:[%s1754_s1 + $0x660] sm:$0xff]  ;;  %v234_v28 = vld [vmem:[%s1754_s1 + $0x630] sm:$0xff]  ;;  %v612_v22 = vrot.slane %v603_v8, %v611_v19 }
  0x60   :  { %886 = vmatprep.subr.bf16.mxu1 %v885_v32  ;;  %v257_v32 = vld [vmem:[%s1754_s1 + $0x6e8] sm:$0xff]  ;;  %v843_v35 = vpack.c.bf16 %v240_v27, %v232_v26  ;;  %v907_v36 = vpack.c.bf16 %v242_v30, %v234_v28 }
  0x61   :  { %v845_v37 = vpack.c.bf16 %v257_v32, %v249_v31 }
  0x62   :  { %824 = vmatpush1.bf16.msra.mxu0 %v823_v38  ;;  %v248_v38 = vld [vmem:[%s1754_s1 + $0x6a0] sm:$0xff] }
  0x63   :  { %888 = vmatpush1.bf16.msra.mxu1 %v887_v39  ;;  %826 = vmatprep.subr.bf16.mxu0 %v825_v40  ;;  %v256_v39 = vld [vmem:[%s1754_s1 + $0x6e0] sm:$0xff]  ;;  %v250_v40 = vld [vmem:[%s1754_s1 + $0x6b0] sm:$0xff] }
  0x64   :  { %890 = vmatprep.subr.bf16.mxu1 %v889_v44  ;;  %v273_v44 = vld [vmem:[%s1754_s1 + $0x768] sm:$0xff]  ;;  %v847_v16 = vpack.c.bf16 %v256_v39, %v248_v38  ;;  %v911_v47 = vpack.c.bf16 %v258_v42, %v250_v40 }
  0x65   :  { %v849_v48 = vpack.c.bf16 %v273_v44, %v265_v43 }
  0x66   :  { %828 = vmatpush1.bf16.msra.mxu0 %v827_v49  ;;  %v264_v49 = vld [vmem:[%s1754_s1 + $0x720] sm:$0xff] }
  0x67   :  { %892 = vmatpush1.bf16.msra.mxu1 %v891_v50  ;;  %830 = vmatprep.subr.bf16.mxu0 %v829_v51  ;;  %v272_v50 = vld [vmem:[%s1754_s1 + $0x760] sm:$0xff]  ;;  %v266_v51 = vld [vmem:[%s1754_s1 + $0x730] sm:$0xff] }
  0x68   :  { %894 = vmatprep.subr.bf16.mxu1 %v893_v55  ;;  %v289_v55 = vld [vmem:[%s1754_s1 + $0x7e8] sm:$0xff]  ;;  %v851_v58 = vpack.c.bf16 %v272_v50, %v264_v49  ;;  %v915_v59 = vpack.c.bf16 %v274_v53, %v266_v51 }
  0x69   :  { %v853_v60 = vpack.c.bf16 %v289_v55, %v281_v54 }
  0x6a   :  { %832 = vmatpush1.bf16.msra.mxu0 %v831_v61  ;;  %v280_v61 = vld [vmem:[%s1754_s1 + $0x7a0] sm:$0xff] }
  0x6b   :  { %896 = vmatpush1.bf16.msra.mxu1 %v895_v62  ;;  %834 = vmatprep.subr.bf16.mxu0 %v833_v63  ;;  %v288_v62 = vld [vmem:[%s1754_s1 + $0x7e0] sm:$0xff]  ;;  %v917_v63 = vpack.c.bf16 %v291_v57, %v283_v56 }
  0x6c   :  { %898 = vmatprep.subr.bf16.mxu1 %v897_v3  ;;  %v855_v2 = vpack.c.bf16 %v288_v62, %v280_v61  ;;  %v919_v3 = vpack.c.bf16 %v290_v1, %v282_v0 }
  0x6e   :  { %836 = vmatpush1.bf16.msra.mxu0 %v835_v9  ;;  %v627_v9 = vsub.s32 5, %v606_v5 }
  0x6f   :  { %900 = vmatpush1.bf16.msra.mxu1 %v899_v10  ;;  %838 = vmatprep.subr.bf16.mxu0 %v837_v11  ;;  %v635_v10 = vsub.s32 7, %v606_v5  ;;  %v624_v11 = vrot.slane %v603_v8, %v623_v6 }
  0x70   :  { %902 = vmatprep.subr.bf16.mxu1 %v901_v17  ;;  %v628_v13 = vrot.slane %v603_v8, %v627_v9  ;;  %v607_v17 = vsub.s32 0, %v606_v5 }
  0x71   :  { %v636_v14 = vrot.slane %v603_v8, %v635_v10 }
  0x72   :  { %840 = vmatpush1.bf16.msra.mxu0 %v839_v23  ;;  %v608_v21 = vrot.slane %v603_v8, %v607_v17  ;;  %v620_v23 = vrot.slane %v603_v8, %v619_v20 }
  0x73   :  { %904 = vmatpush1.bf16.msra.mxu1 %v903_v24  ;;  %842 = vmatprep.subr.bf16.mxu0 %v841_v25 }
  0x74   :  { %906 = vmatprep.subr.bf16.mxu1 %v905_v29 }
  0x76   :  { %844 = vmatpush1.bf16.msra.mxu0 %v843_v35 }
  0x77   :  { %908 = vmatpush1.bf16.msra.mxu1 %v907_v36  ;;  %846 = vmatprep.subr.bf16.mxu0 %v845_v37 }
  0x78   :  { %910 = vmatprep.subr.bf16.mxu1 %v909_v41 }
  0x7a   :  { %848 = vmatpush1.bf16.msra.mxu0 %v847_v16 }
  0x7b   :  { %912 = vmatpush1.bf16.msra.mxu1 %v911_v47  ;;  %850 = vmatprep.subr.bf16.mxu0 %v849_v48 }
  0x7c   :  { %914 = vmatprep.subr.bf16.mxu1 %v913_v52 }
  0x7e   :  { %852 = vmatpush1.bf16.msra.mxu0 %v851_v58 }
  0x7f   :  { %916 = vmatpush1.bf16.msra.mxu1 %v915_v59  ;;  %854 = vmatprep.subr.bf16.mxu0 %v853_v60 }
  0x80   :  { %918 = vmatprep.subr.bf16.mxu1 %v917_v63 }
  0x82   :  { %856 = vmatpush1.bf16.msra.mxu0 %v855_v2 }
  0x83   :  { %920 = vmatpush1.bf16.msra.mxu1 %v919_v3 }
  0x85   :  { %499 = vmatmul.mubr.f32.vlgmr.msra.gmra.mrb[2].mxu0 %v1371_v15 }
  0x86   :  { %570 = vmatmul.mubr.f32.vlgmr.msra.gmra.mrb[2].mxu1 %v1371_v15  ;;  %v616_v15 = vrot.slane %v603_v8, %v615_v18 }
 0x118   :  { %v358_v24 = vpop.f32.mrb[0].mxu0 }
 0x119   :  { %v645_v25 = vadd.f32 %v608_v21, %v358_v24  ;;  %v429_v26 = vpop.f32.mrb[0].mxu1  ;;  %v360_v27 = vpop.f32.mrb[1].mxu0 }
 0x11a   :  { %v647_v28 = vadd.f32 %v616_v15, %v429_v26  ;;  %v646_v29 = vadd.f32 %v612_v22, %v360_v27  ;;  %v431_v30 = vpop.f32.mrb[1].mxu1 }
 0x11b   :  { %653 = vst [vmem:[%s1757_s3] sm:$0xff] %v645_v25  ;;  %v648_v31 = vadd.f32 %v620_v23, %v431_v30 }
 0x11c   :  { %655 = vst [vmem:[%s1757_s3 + $0x10] sm:$0xff] %v647_v28  ;;  %654 = vst [vmem:[%s1757_s3 + $0x8] sm:$0xff] %v646_v29 }
 0x11d   :  { %656 = vst [vmem:[%s1757_s3 + $0x18] sm:$0xff] %v648_v31 }
 0x158   :  { %v500_v32 = vpop.f32.mrb[2].mxu0 }
 0x159   :  { %v649_v33 = vadd.f32 %v624_v11, %v500_v32  ;;  %v571_v34 = vpop.f32.mrb[2].mxu1  ;;  %v502_v35 = vpop.f32.mrb[3].mxu0 }
 0x15a   :  { %v651_v36 = vadd.f32 %v632_v12, %v571_v34  ;;  %v650_v37 = vadd.f32 %v628_v13, %v502_v35  ;;  %v573_v38 = vpop.f32.mrb[3].mxu1 }
 0x15b   :  { %657 = vst [vmem:[%s1757_s3 + $0x20] sm:$0xff] %v649_v33  ;;  %v652_v39 = vadd.f32 %v636_v14, %v573_v38 }
 0x15c   :  { %659 = vst [vmem:[%s1757_s3 + $0x30] sm:$0xff] %v651_v36  ;;  %658 = vst [vmem:[%s1757_s3 + $0x28] sm:$0xff] %v650_v37 }
 0x15d   :  { %660 = vst [vmem:[%s1757_s3 + $0x38] sm:$0xff] %v652_v39 }

</bundles_post_ra>
